<compile_context>
chip_gen: v7x
topology: tpu7x:2x2x1
jax: 0.10.0
libtpu: 0.0.40
codegen_flags: <defaults>
</compile_context>

<pallas_src>
import functools
import math

import jax
import jax.numpy as jnp
from jax.experimental import pallas as pl
from jax.experimental.pallas import tpu as pltpu

LANES = 128
SUBLANES = 8
_PAD_LOGIT = -100.0   # sigmoid/exp underflow => padded elements contribute exactly 0 loss


def _round_up(x, m):
    return ((x + m - 1) // m) * m


def _focal_loss_kernel(pred_ref, true_ref, out_ref, *, gamma, alpha, block_rows):
    pred = pred_ref[...].astype(jnp.float32)
    true = true_ref[...].astype(jnp.float32)

    # BCEWithLogitsLoss(reduction='none'), numerically stable:
    #   max(x, 0) - x*y + log1p(exp(-|x|))
    e = jnp.exp(-jnp.abs(pred))                      # single EUP exp, reused below
    bce = jnp.maximum(pred, 0.0) - pred * true + jnp.log1p(e)

    # sigmoid(x) derived from the same exp:  x >= 0: 1/(1+e),  x < 0: e/(1+e)
    inv = 1.0 / (1.0 + e)
    pred_prob = jnp.where(pred >= 0.0, inv, e * inv)

    p_t = true * pred_prob + (1.0 - true) * (1.0 - pred_prob)
    alpha_factor = true * alpha + (1.0 - true) * (1.0 - alpha)
    omt = 1.0 - p_t
    if gamma == 0.0:
        modulating = jnp.ones_like(omt)
    elif gamma == 1.0:
        modulating = omt
    elif gamma == 1.5:
        modulating = omt * jnp.sqrt(omt)             # avoids pow -> exp(g*log(x))
    elif gamma == 2.0:
        modulating = omt * omt
    else:
        modulating = jnp.power(omt, gamma)

    loss = bce * alpha_factor * modulating

    # Fold (block_rows, 128) -> (8, 128) with pure VPU vreg adds; the expensive
    # cross-lane/sublane reduce is done once outside the kernel.
    out_ref[...] = loss.reshape(block_rows // SUBLANES, SUBLANES, LANES).sum(axis=0)


def _focal_loss_ref(pred, true, gamma=1.5, alpha=0.25, reduction="mean"):
    """Pure-JAX reference mirroring the PyTorch module (also the small-input fallback)."""
    pred = pred.astype(jnp.float32)
    true = true.astype(jnp.float32)
    bce = (jnp.maximum(pred, 0.0) - pred * true
           + jnp.log1p(jnp.exp(-jnp.abs(pred))))
    pred_prob = jax.nn.sigmoid(pred)
    p_t = true * pred_prob + (1.0 - true) * (1.0 - pred_prob)
    alpha_factor = true * alpha + (1.0 - true) * (1.0 - alpha)
    modulating_factor = (1.0 - p_t) ** gamma
    loss = bce * alpha_factor * modulating_factor
    if reduction == "mean":
        return jnp.mean(loss)
    if reduction == "sum":
        return jnp.sum(loss)
    return loss


def focal_loss(pred, true, *, gamma=1.5, alpha=0.25, reduction="mean",
               block_rows=512, min_pallas_elems=1 << 15):
    """Focal loss over arbitrary-shaped logits/targets.

    reduction: 'mean' (BCEWithLogitsLoss default) or 'sum'.
    """
    assert pred.shape == true.shape
    # TODO(synk): reduction='none' (per-element loss tensor) is not implemented
    # in the Pallas path; only 'mean'/'sum' as used by YOLOv8.
    assert reduction in ("mean", "sum")
    n_valid = int(math.prod(pred.shape))

    # Tiny tensors: pallas_call launch overhead dwarfs the math; let XLA fuse it.
    if n_valid < min_pallas_elems:
        return _focal_loss_ref(pred, true, gamma, alpha, reduction)

    # Keep bf16/f32 inputs in their native dtype in HBM (upcast happens in-kernel).
    io_dtype = pred.dtype if pred.dtype in (jnp.float32, jnp.bfloat16) else jnp.float32
    pred_flat = pred.reshape(-1).astype(io_dtype)
    true_flat = true.reshape(-1).astype(io_dtype)

    # Adapt the tile so small inputs don't pad up to a full 512-row tile.
    # Multiple of 16 rows keeps both f32 (8,128) and bf16 (16,128) tiling legal.
    rows_needed = pl.cdiv(n_valid, LANES)
    eff_block_rows = min(block_rows, _round_up(rows_needed, 16))
    eff_block_rows = max(16, (eff_block_rows // 16) * 16)

    tile_elems = eff_block_rows * LANES
    n_pad = (-n_valid) % tile_elems
    if n_pad:
        # Sentinel padding: logit=-100, target=0 gives exactly-zero focal loss,
        # so no in-kernel mask is needed.
        pred_flat = jnp.pad(pred_flat, (0, n_pad), constant_values=_PAD_LOGIT)
        true_flat = jnp.pad(true_flat, (0, n_pad), constant_values=0.0)
    rows = (n_valid + n_pad) // LANES
    num_blocks = rows // eff_block_rows

    pred2d = pred_flat.reshape(rows, LANES)
    true2d = true_flat.reshape(rows, LANES)

    kernel = functools.partial(
        _focal_loss_kernel,
        gamma=float(gamma), alpha=float(alpha), block_rows=eff_block_rows,
    )

    partials = pl.pallas_call(
        kernel,
        out_shape=jax.ShapeDtypeStruct((num_blocks * SUBLANES, LANES), jnp.float32),
        grid_spec=pltpu.PrefetchScalarGridSpec(
            num_scalar_prefetch=0,
            grid=(num_blocks,),
            in_specs=[
                pl.BlockSpec((eff_block_rows, LANES), lambda i: (i, 0)),
                pl.BlockSpec((eff_block_rows, LANES), lambda i: (i, 0)),
            ],
            out_specs=pl.BlockSpec((SUBLANES, LANES), lambda i: (i, 0)),
        ),
        compiler_params=pltpu.CompilerParams(
            # Independent blocks -> parallel grid (v7x shards across both TCs).
            dimension_semantics=("parallel",),
        ),
    )(pred2d, true2d)

    total = jnp.sum(partials)
    if reduction == "sum":
        return total
    return total / jnp.float32(n_valid)


if __name__ == "__main__":
    key = jax.random.PRNGKey(0)
    k1, k2 = jax.random.split(key)

    # NCHW logits and {0,1} targets (batch=2, channels=4, spatial=16x16),
    # as FocalLoss is used on classification logits in YOLOv8.
    pred = jax.random.normal(k1, (2, 4, 16, 16), dtype=jnp.float32) * 2.0
    true = (jax.random.uniform(k2, (2, 4, 16, 16)) > 0.7).astype(jnp.float32)

    # Force the Pallas path for this small demo tensor (production default
    # falls back to fused XLA below min_pallas_elems).
    out = focal_loss(pred, true, gamma=1.5, alpha=0.25, min_pallas_elems=0)
    out = jax.block_until_ready(out)

    ref = _focal_loss_ref(pred, true, gamma=1.5, alpha=0.25)
    assert jnp.allclose(out, ref, rtol=1e-5, atol=1e-6), (out, ref)

    print("KERNEL_OK")
</pallas_src>

<mosaic_0001>
module attributes {stable_mosaic.version = 11 : i64} {
  func.func @_focal_loss_kernel(%arg0: i32, %arg1: memref<16x128xf32, #tpu.memory_space<vmem>>, %arg2: memref<16x128xf32, #tpu.memory_space<vmem>>, %arg3: memref<8x128xf32, #tpu.memory_space<vmem>>) attributes {dimension_semantics = [#tpu.dimension_semantics<parallel>], iteration_bounds = array<i64: 1>, scalar_prefetch = 0 : i64, scratch_operands = 0 : i64, tpu.core_type = #tpu.core_type<tc>, window_params = [{transform_indices = @transform_0, window_bounds = array<i64: 16, 128>}, {transform_indices = @transform_1, window_bounds = array<i64: 16, 128>}, {transform_indices = @transform_2, window_bounds = array<i64: 8, 128>}]} {
    %c0 = arith.constant 0 : index
    %c0_0 = arith.constant 0 : index
    %0 = vector.load %arg1[%c0, %c0_0] : memref<16x128xf32, #tpu.memory_space<vmem>>, vector<16x128xf32>
    %c0_1 = arith.constant 0 : index
    %c0_2 = arith.constant 0 : index
    %1 = vector.load %arg2[%c0_1, %c0_2] : memref<16x128xf32, #tpu.memory_space<vmem>>, vector<16x128xf32>
    %2 = math.absf %0 : vector<16x128xf32>
    %cst = arith.constant 0.000000e+00 : f32
    %3 = vector.broadcast %cst : f32 to vector<16x128xf32>
    %4 = arith.subf %3, %2 : vector<16x128xf32>
    %5 = math.exp %4 : vector<16x128xf32>
    %cst_3 = arith.constant 0.000000e+00 : f32
    %6 = vector.broadcast %cst_3 : f32 to vector<16x128xf32>
    %7 = arith.maximumf %0, %6 : vector<16x128xf32>
    %8 = arith.mulf %0, %1 : vector<16x128xf32>
    %9 = arith.subf %7, %8 : vector<16x128xf32>
    %10 = math.log1p %5 : vector<16x128xf32>
    %11 = arith.addf %9, %10 : vector<16x128xf32>
    %cst_4 = arith.constant 1.000000e+00 : f32
    %12 = vector.broadcast %cst_4 : f32 to vector<16x128xf32>
    %13 = arith.addf %12, %5 : vector<16x128xf32>
    %cst_5 = arith.constant 1.000000e+00 : f32
    %14 = vector.broadcast %cst_5 : f32 to vector<16x128xf32>
    %15 = arith.divf %14, %13 : vector<16x128xf32>
    %cst_6 = arith.constant 0.000000e+00 : f32
    %16 = vector.broadcast %cst_6 : f32 to vector<16x128xf32>
    %17 = arith.cmpf oge, %0, %16 : vector<16x128xf32>
    %18 = arith.mulf %5, %15 : vector<16x128xf32>
    %19 = arith.select %17, %15, %18 : vector<16x128xi1>, vector<16x128xf32>
    %20 = arith.mulf %1, %19 : vector<16x128xf32>
    %cst_7 = arith.constant 1.000000e+00 : f32
    %21 = vector.broadcast %cst_7 : f32 to vector<16x128xf32>
    %22 = arith.subf %21, %1 : vector<16x128xf32>
    %cst_8 = arith.constant 1.000000e+00 : f32
    %23 = vector.broadcast %cst_8 : f32 to vector<16x128xf32>
    %24 = arith.subf %23, %19 : vector<16x128xf32>
    %25 = arith.mulf %22, %24 : vector<16x128xf32>
    %26 = arith.addf %20, %25 : vector<16x128xf32>
    %cst_9 = arith.constant 2.500000e-01 : f32
    %27 = vector.broadcast %cst_9 : f32 to vector<16x128xf32>
    %28 = arith.mulf %1, %27 : vector<16x128xf32>
    %cst_10 = arith.constant 1.000000e+00 : f32
    %29 = vector.broadcast %cst_10 : f32 to vector<16x128xf32>
    %30 = arith.subf %29, %1 : vector<16x128xf32>
    %cst_11 = arith.constant 7.500000e-01 : f32
    %31 = vector.broadcast %cst_11 : f32 to vector<16x128xf32>
    %32 = arith.mulf %30, %31 : vector<16x128xf32>
    %33 = arith.addf %28, %32 : vector<16x128xf32>
    %cst_12 = arith.constant 1.000000e+00 : f32
    %34 = vector.broadcast %cst_12 : f32 to vector<16x128xf32>
    %35 = arith.subf %34, %26 : vector<16x128xf32>
    %36 = math.sqrt %35 : vector<16x128xf32>
    %37 = arith.mulf %35, %36 : vector<16x128xf32>
    %38 = arith.mulf %11, %33 : vector<16x128xf32>
    %39 = arith.mulf %38, %37 : vector<16x128xf32>
    %40 = vector.shape_cast %39 : vector<16x128xf32> to vector<2x8x128xf32>
    %cst_13 = arith.constant dense<0.000000e+00> : vector<8x128xf32>
    %41 = vector.multi_reduction <add>, %40, %cst_13 [0] : vector<2x8x128xf32> to vector<8x128xf32>
    %c0_14 = arith.constant 0 : index
    %c0_15 = arith.constant 0 : index
    %42 = vector.load %arg3[%c0_14, %c0_15] : memref<8x128xf32, #tpu.memory_space<vmem>>, vector<8x128xf32>
    tpu.vector_store %arg3[%c0_14, %c0_15], %41 {strides = array<i32>} : memref<8x128xf32, #tpu.memory_space<vmem>>, vector<8x128xf32>,
    return
  }
  func.func @transform_0(%arg0: i32) -> (i32, i32) {
    %c0_i32 = arith.constant 0 : i32
    %c0_i32_0 = arith.constant 0 : i32
    return %arg0, %c0_i32 : i32, i32
  }
  func.func @transform_1(%arg0: i32) -> (i32, i32) {
    %c0_i32 = arith.constant 0 : i32
    %c0_i32_0 = arith.constant 0 : i32
    return %arg0, %c0_i32 : i32, i32
  }
  func.func @transform_2(%arg0: i32) -> (i32, i32) {
    %c0_i32 = arith.constant 0 : i32
    %c0_i32_0 = arith.constant 0 : i32
    return %arg0, %c0_i32 : i32, i32
  }
}

</mosaic_0001>

<bundles_post_ra>
// kernel: tpu_custom_call.1
= control target key start
LH: loop header
LB: loop body
LE: loop exit
PB: predicated region body
PF: predicated region fallthrough
CT: control target
= control target key end

     0   :  { %7 = vsyncpa [#allocation3], 0  ;;  %s301_s0 = inlined_call_operand.hbm [shape: f32[16,128], index: 0, kind: input, shape index: {}]   ;;  %s302_s1 = inlined_call_operand.hbm [shape: f32[16,128], index: 1, kind: input, shape index: {}]   ;;  %s303_s2 = inlined_call_operand.hbm [shape: f32[8,128], index: 2, kind: output, shape index: {}]  }
   0x1   :  { %8 = vsyncpa [#allocation6], 0 }
   0x2   :  { %9 = vsyncpa [#allocation4], 0  ;;  %s239_s9 = smov [#allocation2]   ;;  %s167_s13 = scalar_lea.hbm %s301_s0, 256 }
   0x3   :  { %s15_s10 = sshll.u32 %s239_s9, 4  ;;  %p168_p0 = scmp.ne.s32.totalorder %s301_s0, %s167_s13  ;;  %s16_s10 = int_to_ptr.vmem [resolvable:$true] %s15_s10 }
   0x4   :  { %p171_p1 = scmp.lt.u32.totalorder %s167_s13, %s301_s0 }
   0x6   :  { %p173_p2 = pnand %p171_p1, %p168_p0 }
   0x8   :  { %176 = shalt.err (!%p173_p2)
}
   0x9   :  { %s177_s18 = scalar_lea.vmem %s16_s10, 256  ;;  %p182_p4 = scmp.lt.s32.totalorder %s16_s10, %s16_s10 }
   0xa   :  { %p178_p3 = scmp.ne.s32.totalorder %s16_s10, %s177_s18  ;;  %p183_p5 = scmp.lt.s32.totalorder %s177_s18, %s177_s18 }
   0xc   :  { %p184_p6 = por %p183_p5, %p182_p4 }
   0xe   :  { %p185_p7 = pnand %p184_p6, %p178_p3 }
  0x10   :  { %188 = shalt.err (!%p185_p7)
}
  0x11   :  { %s240_s19 = smov 128   ;;  %s241_s20 = smov 8  }
  0x12   :  { %21 = dma.hbm_to_vmem [thread:$0]  %s301_s0, 256, %s16_s10, [#allocation3], %s240_s19, %s240_s19, %s241_s20  }
  0x13   :  { %s242_s23 = smov [#allocation5]   ;;  %s189_s27 = scalar_lea.hbm %s302_s1, 256 }
  0x14   :  { %s27_s24 = sshll.u32 %s242_s23, 4  ;;  %p190_p8 = scmp.ne.s32.totalorder %s302_s1, %s189_s27  ;;  %s28_s24 = int_to_ptr.vmem [resolvable:$true] %s27_s24 }
  0x15   :  { %p193_p9 = scmp.lt.u32.totalorder %s189_s27, %s302_s1 }
  0x17   :  { %p195_p10 = pnand %p193_p9, %p190_p8 }
  0x19   :  { %198 = shalt.err (!%p195_p10)
}
  0x1a   :  { %s199_s4 = scalar_lea.vmem %s28_s24, 256  ;;  %p204_p12 = scmp.lt.s32.totalorder %s28_s24, %s28_s24 }
  0x1b   :  { %p200_p11 = scmp.ne.s32.totalorder %s28_s24, %s199_s4  ;;  %p205_p13 = scmp.lt.s32.totalorder %s199_s4, %s199_s4 }
  0x1d   :  { %p206_p0 = por %p205_p13, %p204_p12 }
  0x1f   :  { %p207_p1 = pnand %p206_p0, %p200_p11 }
  0x21   :  { %210 = shalt.err (!%p207_p1)
}
  0x22   :  { %33 = dma.hbm_to_vmem [thread:$0]  %s302_s1, 256, %s28_s24, [#allocation6], %s240_s19, %s240_s19, %s241_s20  }
  0x23   :  { %233 = dma.done.wait [#allocation3], 256  }
  0x24   :  { %234 = vsyncadd [#allocation3], 4294967040 }
  0x25   :  { %235 = dma.done.wait [#allocation6], 256  }
  0x26   :  { %236 = vsyncadd [#allocation6], 4294967040  ;;  %v40_v0 = vld [vmem:[#allocation2] sm:$0xff]  ;;  %v283_v1 = vld [vmem:[#allocation2 + $0x8] sm:$0xff]  ;;  %s243_s1 = smov [#allocation7]  }
  0x27   :  { %v44_v2 = vand.u32 2147483647, %v40_v0  ;;  %v45_v3 = vand.u32 2147483647, %v283_v1  ;;  %v42_v12 = vld [vmem:[#allocation5] sm:$0xff]  ;;  %v43_v14 = vld [vmem:[#allocation5 + $0x8] sm:$0xff] }
  0x28   :  { %vm84_vm0 = vcmp.ge.f32.partialorder %v40_v0, 0.0  ;;  %vm85_vm1 = vcmp.ge.f32.partialorder %v283_v1, 0.0  ;;  %v92_v18 = vsub.f32 1.0, %v42_v12  ;;  %v93_v20 = vsub.f32 1.0, %v43_v14  ;;  %s136_s6 = sshll.u32 %s243_s1, 4  ;;  %s137_s6 = int_to_ptr.vmem [resolvable:$true] %s136_s6 }
  0x29   :  { %v46_v4 = vsub.f32 0.0, %v44_v2  ;;  %v47_v5 = vsub.f32 0.0, %v45_v3  ;;  %v52_v40 = vmax.f32 %v40_v0, 0.0  ;;  %v54_v41 = vmul.f32 %v42_v12, %v40_v0  ;;  %s211_s7 = scalar_lea.vmem %s137_s6, 128  ;;  %p216_p3 = scmp.lt.s32.totalorder %s137_s6, %s137_s6 }
  0x2a   :  { %v53_v42 = vmax.f32 %v283_v1, 0.0  ;;  %v55_v43 = vmul.f32 %v43_v14, %v283_v1  ;;  %v100_v49 = vmul.f32 0.25, %v42_v12  ;;  %v102_v50 = vmul.f32 0.75, %v92_v18  ;;  %p212_p2 = scmp.ne.s32.totalorder %s137_s6, %s211_s7  ;;  %p217_p4 = scmp.lt.s32.totalorder %s211_s7, %s211_s7 }
  0x2b   :  { %v48_v6 = vmul.f32 1.442695, %v46_v4  ;;  %v50_v7 = vmul.f32 1.442695, %v47_v5  ;;  %v56_v48 = vsub.f32 %v52_v40, %v54_v41  ;;  %v101_v53 = vmul.f32 0.25, %v43_v14 }
  0x2c   :  { %v57_v51 = vsub.f32 %v53_v42, %v55_v43  ;;  %v103_v54 = vmul.f32 0.75, %v93_v20  ;;  %v104_v57 = vadd.f32 %v102_v50, %v100_v49  ;;  %p218_p5 = por %p217_p4, %p216_p3 }
  0x2d   :  { %151 = vpow2.f32 %v48_v6 }
  0x2e   :  { %153 = vpow2.f32 %v50_v7  ;;  %v105_v60 = vadd.f32 %v103_v54, %v101_v53  ;;  %p219_p6 = pnand %p218_p5, %p212_p2 }
  0x37   :  { %v152_v8 = vpop.eup %151 }
  0x38   :  { %v154_v9 = vpop.eup %153  ;;  %v58_v10 = vadd.f32 1.0, %v152_v8  ;;  %v61_v26 = vmul.f32 -0.5, %v152_v8  ;;  %v64_v35 = vand.u32 2147483647, %v152_v8 }
  0x39   :  { %v67_v11 = vadd.f32 1.0, %v154_v9  ;;  %v70_v28 = vmul.f32 -0.5, %v154_v9  ;;  %v73_v39 = vand.u32 2147483647, %v154_v9 }
  0x3a   :  { %155 = vrcp.f32 %v58_v10  ;;  %v62_v32 = vadd.f32 1.0, %v61_v26  ;;  %vm65_vm2 = vcmp.lt.f32.partialorder %v64_v35, 0.0004427343 }
  0x3b   :  { %157 = vrcp.f32 %v67_v11  ;;  %v71_v36 = vadd.f32 1.0, %v70_v28  ;;  %vm74_vm3 = vcmp.lt.f32.partialorder %v73_v39, 0.0004427343 }
  0x3c   :  { %159 = vlog2.f32 %v58_v10  ;;  %v63_v45 = vmul.f32 %v152_v8, %v62_v32 }
  0x3d   :  { %161 = vlog2.f32 %v67_v11  ;;  %v72_v47 = vmul.f32 %v154_v9, %v71_v36 }
  0x44   :  { %v156_v13 = vpop.eup %155 }
  0x45   :  { %v158_v15 = vpop.eup %157  ;;  %v86_v16 = vmul.f32 %v156_v13, %v152_v8 }
  0x46   :  { %v87_v17 = vmul.f32 %v158_v15, %v154_v9  ;;  %v160_v34 = vpop.eup %159 }
  0x47   :  { %v88_v19 = vsel %vm84_vm0, %v156_v13, %v86_v16  ;;  %v162_v38 = vpop.eup %161  ;;  %v60_v44 = vmul.f32 0.6931472, %v160_v34 }
  0x48   :  { %v89_v21 = vsel %vm85_vm1, %v158_v15, %v87_v17  ;;  %v90_v22 = vmul.f32 %v88_v19, %v42_v12  ;;  %v94_v23 = vsub.f32 1.0, %v88_v19  ;;  %v69_v46 = vmul.f32 0.6931472, %v162_v38 }
  0x49   :  { %v91_v24 = vmul.f32 %v89_v21, %v43_v14  ;;  %v95_v25 = vsub.f32 1.0, %v89_v21  ;;  %v66_v52 = vsel %vm65_vm2, %v63_v45, %v60_v44 }
  0x4a   :  { %v96_v27 = vmul.f32 %v94_v23, %v92_v18  ;;  %v75_v55 = vsel %vm74_vm3, %v72_v47, %v69_v46  ;;  %v76_v56 = vadd.f32 %v66_v52, %v56_v48 }
  0x4b   :  { %v97_v29 = vmul.f32 %v95_v25, %v93_v20  ;;  %v77_v59 = vadd.f32 %v75_v55, %v57_v51 }
  0x4c   :  { %v98_v30 = vadd.f32 %v96_v27, %v90_v22  ;;  %v124_v3 = vmul.f32 %v104_v57, %v76_v56 }
  0x4d   :  { %v99_v31 = vadd.f32 %v97_v29, %v91_v24  ;;  %v125_v6 = vmul.f32 %v105_v60, %v77_v59 }
  0x4e   :  { %v106_v33 = vsub.f32 1.0, %v98_v30 }
  0x4f   :  { %v107_v37 = vsub.f32 1.0, %v99_v31 }
  0x50   :  { %163 = vrsqrt.f32 %v106_v33  ;;  %vm110_vm4 = vcmp.eq.f32.partialorder %v106_v33, inf  ;;  %v113_v61 = vand.u32 2147483648, %v106_v33  ;;  %vm112_vm5 = vcmp.eq.f32.partialorder %v106_v33, 0.0 }
  0x51   :  { %165 = vrsqrt.f32 %v107_v37  ;;  %vm117_vm6 = vcmp.eq.f32.partialorder %v107_v37, inf  ;;  %v120_v0 = vand.u32 2147483648, %v107_v37  ;;  %vm119_vm7 = vcmp.eq.f32.partialorder %v107_v37, 0.0 }
  0x5a   :  { %v164_v58 = vpop.eup %163 }
  0x5b   :  { %v166_v62 = vpop.eup %165  ;;  %v109_v63 = vmul.f32 %v164_v58, %v106_v33 }
  0x5c   :  { %v116_v1 = vmul.f32 %v166_v62, %v107_v37 }
  0x5d   :  { %v111_v2 = vsel %vm110_vm4, %v106_v33, %v109_v63 }
  0x5e   :  { %v114_v4 = vsel %vm112_vm5, %v113_v61, %v111_v2  ;;  %v118_v5 = vsel %vm117_vm6, %v107_v37, %v116_v1 }
  0x5f   :  { %v121_v7 = vsel %vm119_vm7, %v120_v0, %v118_v5  ;;  %v122_v8 = vmul.f32 %v114_v4, %v106_v33 }
  0x60   :  { %v123_v9 = vmul.f32 %v121_v7, %v107_v37 }
  0x61   :  { %v126_v10 = vmul.f32 %v124_v3, %v122_v8 }
  0x62   :  { %v127_v11 = vmul.f32 %v125_v6, %v123_v9 }
  0x64   :  { %v128_v12 = vadd.f32 %v127_v11, %v126_v10 }
  0x66   :  { %129 = vst [vmem:[#allocation7] sm:$0xff] %v128_v12 }
  0x67   :  { %222 = shalt.err (!%p219_p6)
}
  0x68   :  { %s223_s10 = scalar_lea.hbm %s303_s2, 128 }
  0x69   :  { %p224_p7 = scmp.ne.s32.totalorder %s303_s2, %s223_s10  ;;  %p227_p8 = scmp.lt.u32.totalorder %s223_s10, %s303_s2 }
  0x6b   :  { %p229_p9 = pnand %p227_p8, %p224_p7 }
  0x6d   :  { %232 = shalt.err (!%p229_p9)
}
  0x6e   :  { %139 = dma.vmem_to_hbm [thread:$0]  %s137_s6, 128, %s303_s2, [#allocation4]  }
  0x6f   :  { %237 = dma.done.wait [#allocation4], 128  }
  0x70   :  { %238 = vsyncadd [#allocation4], 4294967168 }
  0x71   :  { %143 = vsyncpa [#allocation3], 1 }
  0x72   :  { %144 = vsyncpa [#allocation6], 1 }
  0x73   :  { %145 = vsyncpa [#allocation4], 1 }

</bundles_post_ra>
